<compile_context>
chip_gen: v7x
topology: tpu7x:2x2x1
jax: 0.10.0
libtpu: 0.0.40
codegen_flags: <defaults>
</compile_context>

<pallas_src>
import math
import jax
import jax.numpy as jnp
from jax.experimental import pallas as pl
from jax.experimental.pallas import tpu as pltpu

# Layer dims (out, in), exactly as in the PyTorch module.
_LAYER_DIMS = [(32, 1), (16, 32), (32, 16), (5, 32)]
_SLAB_ROWS = 32 + 16 + 32 + 5        # 85; layer row offsets 0 / 32 / 48 / 80
_SLAB_COLS = 33                       # max fan-in (32) + 1 bias column
_N_OUT = 5


def mlp_kernel(p_ref, x_ref, o_ref):
    # x_ref: (1, TB) with the batch on the lane axis.
    x = x_ref[...]

    # Layer 1: fan-in == 1 -> outer product on the VPU (no K=1 MXU matmul).
    w1 = p_ref[0:32, 0:1]            # (32, 1)
    b1 = p_ref[0:32, 32:33]          # (32, 1)
    h = jnp.tanh(w1 * x + b1)        # (32, TB)

    # Layer 2: (16,32) @ (32,TB) on the MXU, f32 accumulation.
    w2 = p_ref[32:48, 0:32]
    b2 = p_ref[32:48, 32:33]
    h = jnp.tanh(jnp.dot(w2, h, preferred_element_type=jnp.float32) + b2)   # (16, TB)

    # Layer 3: (32,16) @ (16,TB)
    w3 = p_ref[48:80, 0:16]
    b3 = p_ref[48:80, 32:33]
    h = jnp.tanh(jnp.dot(w3, h, preferred_element_type=jnp.float32) + b3)   # (32, TB)

    # Layer 4 (no activation): (5,32) @ (32,TB)
    w4 = p_ref[80:85, 0:32]
    b4 = p_ref[80:85, 32:33]
    o_ref[...] = jnp.dot(w4, h, preferred_element_type=jnp.float32) + b4    # (5, TB)


def pack_params(params):
    """Pack W1..W4 / b1..b4 into a single (85, 33) f32 slab.

    Layer l occupies `out_l` consecutive rows; columns [0:in_l] hold W (out,in)
    in PyTorch orientation, column 32 holds the bias. Row offsets (0,32,48,80)
    are all multiples of 8 -> sublane-aligned static slices in the kernel."""
    blocks = []
    for idx, (fout, fin) in enumerate(_LAYER_DIMS, start=1):
        w = params[f"w{idx}"].astype(jnp.float32)                     # (fout, fin)
        b = params[f"b{idx}"].astype(jnp.float32).reshape(fout, 1)    # (fout, 1)
        pad = jnp.zeros((fout, _SLAB_COLS - 1 - fin), jnp.float32)
        blocks.append(jnp.concatenate([w, pad, b], axis=1))
    slab = jnp.concatenate(blocks, axis=0)
    assert slab.shape == (_SLAB_ROWS, _SLAB_COLS)
    return slab


def newton2d_forward(x, params, *, max_tile=8192):
    """x: (B, 1) float32. Returns (B, 5) float32."""
    B, fin = x.shape
    assert fin == 1

    slab = pack_params(params)

    # Batch on the lane axis.
    xt = x.reshape(1, B).astype(jnp.float32)

    # Pick a lane-multiple tile; collapse the grid to one step when possible.
    if B <= max_tile:
        tb = max(128, pl.cdiv(B, 128) * 128)
        b_pad = tb
    else:
        tb = max_tile
        b_pad = pl.cdiv(B, tb) * tb
    if b_pad != B:
        xt = jnp.pad(xt, ((0, 0), (0, b_pad - B)))

    flops = 2 * b_pad * sum(fo * fi for fo, fi in _LAYER_DIMS)
    transcendentals = b_pad * (32 + 16 + 32)
    bytes_accessed = b_pad * (1 + _N_OUT) * 4 + slab.size * 4

    out_t = pl.pallas_call(
        mlp_kernel,
        out_shape=jax.ShapeDtypeStruct((_N_OUT, b_pad), jnp.float32),
        grid_spec=pltpu.PrefetchScalarGridSpec(
            num_scalar_prefetch=0,
            grid=(b_pad // tb,),
            in_specs=[
                pl.BlockSpec(slab.shape, lambda i: (0, 0)),   # resident param slab
                pl.BlockSpec((1, tb), lambda i: (0, i)),      # lane-dense x tile
            ],
            out_specs=pl.BlockSpec((_N_OUT, tb), lambda i: (0, i)),
        ),
        compiler_params=pltpu.CompilerParams(
            dimension_semantics=("parallel",)),
        cost_estimate=pl.CostEstimate(
            flops=flops,
            transcendentals=transcendentals,
            bytes_accessed=bytes_accessed),
    )(slab, xt)

    # Strip batch padding and return in the PyTorch (B, 5) convention.
    return out_t[:, :B].T


def init_params(key):
    """PyTorch nn.Linear default init: U(-1/sqrt(fan_in), +1/sqrt(fan_in)).
    Weights stored (out, in) — PyTorch native orientation."""
    params = {}
    for idx, (fout, fin) in enumerate(_LAYER_DIMS, start=1):
        key, kw, kb = jax.random.split(key, 3)
        bound = 1.0 / math.sqrt(fin)
        params[f"w{idx}"] = jax.random.uniform(
            kw, (fout, fin), jnp.float32, minval=-bound, maxval=bound)
        params[f"b{idx}"] = jax.random.uniform(
            kb, (fout,), jnp.float32, minval=-bound, maxval=bound)
    return params


def reference_forward(x, params):
    h = x
    for idx in range(1, 5):
        w = params[f"w{idx}"]         # (out, in)
        b = params[f"b{idx}"]         # (out,)
        h = jnp.dot(h, w.T) + b
        if idx < 4:
            h = jnp.tanh(h)
    return h


if __name__ == "__main__":
    key = jax.random.PRNGKey(0)
    kp, kx = jax.random.split(key)
    params = init_params(kp)

    B = 256  # batch of scalar inputs, (B, 1) like the PyTorch module expects
    x = jax.random.normal(kx, (B, 1), jnp.float32)

    out = newton2d_forward(x, params)
    out = jax.block_until_ready(out)

    ref = reference_forward(x, params)
    assert out.shape == (B, 5)
    assert jnp.allclose(out, ref, atol=1e-5, rtol=1e-5), "mismatch vs JAX reference"

    print("KERNEL_OK")
</pallas_src>

<mosaic_0001>
module attributes {stable_mosaic.version = 11 : i64} {
  func.func @mlp_kernel(%arg0: i32, %arg1: memref<85x33xf32, #tpu.memory_space<vmem>>, %arg2: memref<1x256xf32, #tpu.memory_space<vmem>>, %arg3: memref<5x256xf32, #tpu.memory_space<vmem>>) attributes {dimension_semantics = [#tpu.dimension_semantics<parallel>], iteration_bounds = array<i64: 1>, scalar_prefetch = 0 : i64, scratch_operands = 0 : i64, tpu.core_type = #tpu.core_type<tc>, window_params = [{pipeline_mode = #tpu.pipeline_mode<synchronous>, transform_indices = @transform_0, window_bounds = array<i64: 85, 33>}, {transform_indices = @transform_1, window_bounds = array<i64: 1, 256>}, {transform_indices = @transform_2, window_bounds = array<i64: 5, 256>}]} {
    %c0 = arith.constant 0 : index
    %c0_0 = arith.constant 0 : index
    %0 = vector.load %arg2[%c0, %c0_0] : memref<1x256xf32, #tpu.memory_space<vmem>>, vector<1x256xf32>
    %c0_1 = arith.constant 0 : index
    %c0_2 = arith.constant 0 : index
    %1 = vector.load %arg1[%c0_1, %c0_2] : memref<85x33xf32, #tpu.memory_space<vmem>>, vector<32x1xf32>
    %c0_3 = arith.constant 0 : index
    %c32 = arith.constant 32 : index
    %2 = vector.load %arg1[%c0_3, %c32] : memref<85x33xf32, #tpu.memory_space<vmem>>, vector<32x1xf32>
    %3 = vector.broadcast %1 : vector<32x1xf32> to vector<32x256xf32>
    %4 = vector.broadcast %0 : vector<1x256xf32> to vector<32x256xf32>
    %5 = arith.mulf %3, %4 : vector<32x256xf32>
    %6 = vector.broadcast %2 : vector<32x1xf32> to vector<32x256xf32>
    %7 = arith.addf %5, %6 : vector<32x256xf32>
    %8 = math.tanh %7 : vector<32x256xf32>
    %c32_4 = arith.constant 32 : index
    %c0_5 = arith.constant 0 : index
    %9 = vector.load %arg1[%c32_4, %c0_5] : memref<85x33xf32, #tpu.memory_space<vmem>>, vector<16x32xf32>
    %c32_6 = arith.constant 32 : index
    %c32_7 = arith.constant 32 : index
    %10 = vector.load %arg1[%c32_6, %c32_7] : memref<85x33xf32, #tpu.memory_space<vmem>>, vector<16x1xf32>
    %cst = arith.constant dense<0.000000e+00> : vector<16x256xf32>
    %11 = tpu.matmul %9, %8, %cst {dimension_numbers = #tpu.dot_dimension_numbers<[1], [0], [0], [1], [0, 0, 1, 1], [], []>} : vector<16x32xf32>, vector<32x256xf32>, vector<16x256xf32> -> vector<16x256xf32>
    %12 = vector.broadcast %10 : vector<16x1xf32> to vector<16x256xf32>
    %13 = arith.addf %11, %12 : vector<16x256xf32>
    %14 = math.tanh %13 : vector<16x256xf32>
    %c48 = arith.constant 48 : index
    %c0_8 = arith.constant 0 : index
    %15 = vector.load %arg1[%c48, %c0_8] : memref<85x33xf32, #tpu.memory_space<vmem>>, vector<32x16xf32>
    %c48_9 = arith.constant 48 : index
    %c32_10 = arith.constant 32 : index
    %16 = vector.load %arg1[%c48_9, %c32_10] : memref<85x33xf32, #tpu.memory_space<vmem>>, vector<32x1xf32>
    %cst_11 = arith.constant dense<0.000000e+00> : vector<32x256xf32>
    %17 = tpu.matmul %15, %14, %cst_11 {dimension_numbers = #tpu.dot_dimension_numbers<[1], [0], [0], [1], [0, 0, 1, 1], [], []>} : vector<32x16xf32>, vector<16x256xf32>, vector<32x256xf32> -> vector<32x256xf32>
    %18 = vector.broadcast %16 : vector<32x1xf32> to vector<32x256xf32>
    %19 = arith.addf %17, %18 : vector<32x256xf32>
    %20 = math.tanh %19 : vector<32x256xf32>
    %c80 = arith.constant 80 : index
    %c0_12 = arith.constant 0 : index
    %21 = vector.load %arg1[%c80, %c0_12] : memref<85x33xf32, #tpu.memory_space<vmem>>, vector<5x32xf32>
    %c80_13 = arith.constant 80 : index
    %c32_14 = arith.constant 32 : index
    %22 = vector.load %arg1[%c80_13, %c32_14] : memref<85x33xf32, #tpu.memory_space<vmem>>, vector<5x1xf32>
    %cst_15 = arith.constant dense<0.000000e+00> : vector<5x256xf32>
    %23 = tpu.matmul %21, %20, %cst_15 {dimension_numbers = #tpu.dot_dimension_numbers<[1], [0], [0], [1], [0, 0, 1, 1], [], []>} : vector<5x32xf32>, vector<32x256xf32>, vector<5x256xf32> -> vector<5x256xf32>
    %24 = vector.broadcast %22 : vector<5x1xf32> to vector<5x256xf32>
    %25 = arith.addf %23, %24 : vector<5x256xf32>
    %c0_16 = arith.constant 0 : index
    %c0_17 = arith.constant 0 : index
    %26 = vector.load %arg3[%c0_16, %c0_17] : memref<5x256xf32, #tpu.memory_space<vmem>>, vector<5x256xf32>
    tpu.vector_store %arg3[%c0_16, %c0_17], %25 {strides = array<i32>} : memref<5x256xf32, #tpu.memory_space<vmem>>, vector<5x256xf32>,
    return
  }
  func.func @transform_0(%arg0: i32) -> (i32, i32) {
    %c0_i32 = arith.constant 0 : i32
    %c0_i32_0 = arith.constant 0 : i32
    %c0_i32_1 = arith.constant 0 : i32
    return %c0_i32, %c0_i32_0 : i32, i32
  }
  func.func @transform_1(%arg0: i32) -> (i32, i32) {
    %c0_i32 = arith.constant 0 : i32
    %c0_i32_0 = arith.constant 0 : i32
    return %c0_i32, %arg0 : i32, i32
  }
  func.func @transform_2(%arg0: i32) -> (i32, i32) {
    %c0_i32 = arith.constant 0 : i32
    %c0_i32_0 = arith.constant 0 : i32
    return %c0_i32, %arg0 : i32, i32
  }
}

</mosaic_0001>

<bundles_post_ra>
// kernel: tpu_custom_call.1
= control target key start
LH: loop header
LB: loop body
LE: loop exit
PB: predicated region body
PF: predicated region fallthrough
CT: control target
= control target key end

     0   :  { %v511_v1 = vmov 32   ;;  %v512_v2 = vmov 0   ;;  %s616_s0 = inlined_call_operand.vmem [shape: f32[85,33], index: 0, kind: input, shape index: {}]   ;;  %s617_s1 = inlined_call_operand.vmem [shape: f32[1,256], index: 1, kind: input, shape index: {}]   ;;  %s618_s2 = inlined_call_operand.hbm [shape: f32[5,256], index: 2, kind: output, shape index: {}]  }
   0x1   :  { %v13_v0 = vld [vmem:[%s616_s0] sm:$0xff]  ;;  %443 = vset.pattern.permute.xlu1 %v511_v1  ;;  %442 = vset.pattern.permute.xlu0 %v512_v2  ;;  %v14_v3 = vld [vmem:[%s616_s0 + $0x8] sm:$0xff] }
   0x2   :  { %57 = vperm.xlu1 %443, %v13_v0   ;;  %19 = vperm.xlu0 %442, %v13_v0  }
   0x3   :  { %7 = vsyncpa [#allocation3], 0  ;;  %v15_v4 = vld [vmem:[%s616_s0 + $0x10] sm:$0xff]  ;;  %v16_v5 = vld [vmem:[%s616_s0 + $0x18] sm:$0xff]  ;;  %v513_v13 = vmov 0.0   ;;  %v38_v14 = vlaneseq  ;;  %vm100_vm0 = vcmask 261120  }
   0x4   :  { %v545_v6 = vld [vmem:[%s616_s0 + $0x28] sm:$0xff]  ;;  %v550_v7 = vld [vmem:[%s616_s0 + $0x20] sm:$0xff]  ;;  %v557_v8 = vld [vmem:[%s616_s0 + $0x38] sm:$0xff]  ;;  %169 = vmatprep.mubr.f32.mxu0 %v513_v13  ;;  %283 = vmatprep.mubr.f32.mxu1 %v513_v13  ;;  %vm210_vm1 = vcmask 130048  }
   0x5   :  { %v562_v9 = vld [vmem:[%s616_s0 + $0x30] sm:$0xff]  ;;  %v569_v10 = vld [vmem:[%s616_s0 + $0x48] sm:$0xff]  ;;  %v574_v11 = vld [vmem:[%s616_s0 + $0x40] sm:$0xff]  ;;  %v39_v15 = vshrl.u32 %v38_v14, 7 }
   0x6   :  { %61 = vperm.xlu1 %443, %v14_v3   ;;  %24 = vperm.xlu0 %442, %v14_v3   ;;  %v581_v12 = vld [vmem:[%s616_s0 + $0x50] sm:$0x1f]  ;;  %v12_v18 = vld [vmem:[%s617_s1] sm:$0x3]  ;;  %s514_s0 = smov [#allocation2]  }
   0x7   :  { %v40_v16 = vsub.s32 0, %v39_v15  ;;  %v44_v17 = vsub.s32 1, %v39_v15  ;;  %s403_s1 = sshll.u32 %s514_s0, 4  ;;  %s404_s1 = int_to_ptr.vmem [resolvable:$true] %s403_s1 }
   0x8   :  { %s487_s5 = scalar_lea.vmem %s404_s1, 256  ;;  %p492_p1 = scmp.lt.s32.totalorder %s404_s1, %s404_s1 }
   0x9   :  { %v41_v19 = vrot.slane %v12_v18, %v40_v16  ;;  %v45_v20 = vrot.slane %v12_v18, %v44_v17  ;;  %p488_p0 = scmp.ne.s32.totalorder %s404_s1, %s487_s5  ;;  %p493_p2 = scmp.lt.s32.totalorder %s487_s5, %s487_s5 }
   0xa   :  { %444 = vset.pattern.permute.xlu1 %v512_v2  ;;  %29 = vperm.xlu0 %442, %v15_v4  }
   0xb   :  { %34 = vperm.xlu1 %444, %v16_v5   ;;  %p494_p3 = por %p493_p2, %p492_p1 }
   0xd   :  { %p495_p4 = pnand %p494_p3, %p488_p0 }
   0xe   :  { %445 = vset.pattern.permute.xlu0 %v511_v1 }
   0xf   :  { %446 = vset.pattern.permute.xlu1 %v511_v1  ;;  %65 = vperm.xlu0 %445, %v15_v4  }
  0x10   :  { %69 = vperm.xlu1 %446, %v16_v5  }
  0x13   :  { %97 = vperm.xlu0 %445, %v545_v6  }
  0x14   :  { %92 = vperm.xlu1 %446, %v550_v7  }
  0x17   :  { %197 = vperm.xlu0 %445, %v557_v8  }
  0x18   :  { %192 = vperm.xlu1 %446, %v562_v9  }
  0x1b   :  { %207 = vperm.xlu0 %445, %v569_v10  }
  0x1c   :  { %202 = vperm.xlu1 %446, %v574_v11  }
  0x20   :  { %319 = vperm.xlu1 %446, %v581_v12  }
  0x81   :  { %v58_v21 = vpop.permute.xlu1 %57  ;;  %v20_v22 = vpop.permute.xlu0 %19 }
  0x82   :  { %v48_v23 = vmul.f32 %v41_v19, %v20_v22  ;;  %v49_v24 = vmul.f32 %v45_v20, %v20_v22 }
  0x84   :  { %v72_v25 = vadd.f32 %v58_v21, %v48_v23  ;;  %v73_v26 = vadd.f32 %v58_v21, %v49_v24 }
  0x85   :  { %v62_v27 = vpop.permute.xlu1 %61  ;;  %v25_v28 = vpop.permute.xlu0 %24 }
  0x86   :  { %v50_v29 = vmul.f32 %v41_v19, %v25_v28  ;;  %v51_v30 = vmul.f32 %v45_v20, %v25_v28  ;;  %447 = vtanh.f32 %v72_v25 }
  0x87   :  { %449 = vtanh.f32 %v73_v26 }
  0x88   :  { %v74_v31 = vadd.f32 %v62_v27, %v50_v29  ;;  %v75_v32 = vadd.f32 %v62_v27, %v51_v30 }
  0x89   :  { %v30_v33 = vpop.permute.xlu0 %29 }
  0x8a   :  { %451 = vtanh.f32 %v74_v31  ;;  %v35_v34 = vpop.permute.xlu1 %34  ;;  %v52_v35 = vmul.f32 %v41_v19, %v30_v33  ;;  %v53_v36 = vmul.f32 %v45_v20, %v30_v33 }
  0x8b   :  { %453 = vtanh.f32 %v75_v32  ;;  %v54_v37 = vmul.f32 %v41_v19, %v35_v34  ;;  %v55_v38 = vmul.f32 %v45_v20, %v35_v34 }
  0x8e   :  { %v66_v39 = vpop.permute.xlu0 %65 }
  0x8f   :  { %v76_v40 = vadd.f32 %v66_v39, %v52_v35  ;;  %v77_v41 = vadd.f32 %v66_v39, %v53_v36  ;;  %v70_v42 = vpop.permute.xlu1 %69 }
  0x90   :  { %v78_v43 = vadd.f32 %v70_v42, %v54_v37  ;;  %v79_v44 = vadd.f32 %v70_v42, %v55_v38  ;;  %v448_v45 = vpop.eup %447 }
  0x91   :  { %455 = vtanh.f32 %v76_v40  ;;  %v450_v46 = vpop.eup %449 }
  0x92   :  { %457 = vtanh.f32 %v77_v41  ;;  %v98_v62 = vpop.permute.xlu0 %97 }
  0x93   :  { %459 = vtanh.f32 %v78_v43  ;;  %v93_v57 = vpop.permute.xlu1 %92 }
  0x94   :  { %v452_v47 = vpop.eup %451  ;;  %461 = vtanh.f32 %v79_v44 }
  0x95   :  { %v454_v48 = vpop.eup %453  ;;  %v420_v49 = vpack.c.bf16 %v452_v47, %v448_v45 }
  0x96   :  { %v418_v50 = vpack.c.bf16 %v454_v48, %v450_v46  ;;  %v198_v20 = vpop.permute.xlu0 %197 }
  0x97   :  { %v193_v15 = vpop.permute.xlu1 %192 }
  0x98   :  { %419 = vmatprep.subr.bf16.mxu0 %v418_v50 }
  0x99   :  { %421 = vmatpush1.bf16.msra.mxu0 %v420_v49 }
  0x9b   :  { %v456_v51 = vpop.eup %455  ;;  %v203_v23 = vpop.permute.xlu1 %202 }
  0x9c   :  { %v458_v52 = vpop.eup %457 }
  0x9d   :  { %v460_v53 = vpop.eup %459 }
  0x9e   :  { %v462_v54 = vpop.eup %461  ;;  %v424_v55 = vpack.c.bf16 %v460_v53, %v456_v51 }
  0x9f   :  { %v422_v56 = vpack.c.bf16 %v462_v54, %v458_v52  ;;  %v320_v42 = vpop.permute.xlu1 %319 }
  0xa1   :  { %423 = vmatprep.subr.bf16.mxu0 %v422_v56 }
  0xa2   :  { %425 = vmatpush1.bf16.msra.mxu0 %v424_v55 }
  0xa5   :  { %411 = vmatmul.mubr.msk.f32.vlgmr.msra.gmra.mrb[0].mxu0 %vm100_vm0, %v550_v7 }
  0xa6   :  { %175 = vmatprep.mubr.f32.mxu0 %v513_v13 }
  0xa9   :  { %412 = vmatmul.mubr.msk.f32.gmra.mrb[2].mxu0 %vm100_vm0, %v545_v6 }
  0xaa   :  { %388 = vmatprep.mubr.f32.mxu0 %v513_v13 }
 0x178   :  { %v171_v58 = vpop.f32.mrb[0].mxu0 }
 0x179   :  { %v172_v59 = vadd.f32 %v171_v58, %v93_v57  ;;  %v173_v60 = vpop.f32.mrb[1].mxu0 }
 0x17a   :  { %v174_v61 = vadd.f32 %v173_v60, %v93_v57 }
 0x17b   :  { %463 = vtanh.f32 %v172_v59 }
 0x17c   :  { %v177_v63 = vpop.f32.mrb[2].mxu0  ;;  %465 = vtanh.f32 %v174_v61 }
 0x17d   :  { %v178_v0 = vadd.f32 %v177_v63, %v98_v62  ;;  %v179_v1 = vpop.f32.mrb[3].mxu0 }
 0x17e   :  { %v180_v2 = vadd.f32 %v179_v1, %v98_v62 }
 0x17f   :  { %467 = vtanh.f32 %v178_v0 }
 0x180   :  { %469 = vtanh.f32 %v180_v2 }
 0x185   :  { %v464_v3 = vpop.eup %463 }
 0x186   :  { %v466_v4 = vpop.eup %465 }
 0x189   :  { %v468_v5 = vpop.eup %467 }
 0x18a   :  { %v470_v6 = vpop.eup %469  ;;  %v428_v7 = vpack.c.bf16 %v468_v5, %v464_v3 }
 0x18b   :  { %v426_v14 = vpack.c.bf16 %v470_v6, %v466_v4 }
 0x18d   :  { %427 = vmatprep.subr.bf16.mxu1 %v426_v14 }
 0x18e   :  { %429 = vmatpush1.bf16.msra.mxu1 %v428_v7 }
 0x191   :  { %413 = vmatmul.mubr.msk.f32.vlgmr.msra.gmra.mrb[0].mxu1 %vm210_vm1, %v562_v9 }
 0x192   :  { %289 = vmatprep.mubr.f32.mxu1 %v513_v13 }
 0x195   :  { %414 = vmatmul.mubr.msk.f32.gmra.mrb[2].mxu1 %vm210_vm1, %v557_v8 }
 0x196   :  { %295 = vmatprep.mubr.f32.mxu1 %v513_v13 }
 0x199   :  { %415 = vmatmul.mubr.msk.f32.gmra.mrb[4].mxu1 %vm210_vm1, %v574_v11 }
 0x19a   :  { %301 = vmatprep.mubr.f32.mxu1 %v513_v13 }
 0x19d   :  { %416 = vmatmul.mubr.msk.f32.gmra.mrb[6].mxu1 %vm210_vm1, %v569_v10  ;;  %v208_v10 = vpop.permute.xlu0 %207 }
 0x264   :  { %v285_v16 = vpop.f32.mrb[0].mxu1 }
 0x265   :  { %v286_v17 = vadd.f32 %v285_v16, %v193_v15  ;;  %v287_v18 = vpop.f32.mrb[1].mxu1 }
 0x266   :  { %v288_v19 = vadd.f32 %v287_v18, %v193_v15 }
 0x267   :  { %471 = vtanh.f32 %v286_v17 }
 0x268   :  { %v291_v21 = vpop.f32.mrb[2].mxu1  ;;  %473 = vtanh.f32 %v288_v19 }
 0x269   :  { %v292_v9 = vadd.f32 %v291_v21, %v198_v20  ;;  %v293_v22 = vpop.f32.mrb[3].mxu1 }
 0x26a   :  { %v294_v8 = vadd.f32 %v293_v22, %v198_v20 }
 0x26b   :  { %475 = vtanh.f32 %v292_v9 }
 0x26c   :  { %477 = vtanh.f32 %v294_v8  ;;  %v297_v11 = vpop.f32.mrb[4].mxu1 }
 0x26d   :  { %v298_v24 = vadd.f32 %v297_v11, %v203_v23  ;;  %v299_v13 = vpop.f32.mrb[5].mxu1 }
 0x26e   :  { %v300_v25 = vadd.f32 %v299_v13, %v203_v23 }
 0x26f   :  { %479 = vtanh.f32 %v298_v24 }
 0x270   :  { %v303_v26 = vpop.f32.mrb[6].mxu1  ;;  %481 = vtanh.f32 %v300_v25 }
 0x271   :  { %v304_v27 = vadd.f32 %v303_v26, %v208_v10  ;;  %v305_v28 = vpop.f32.mrb[7].mxu1  ;;  %v472_v30 = vpop.eup %471 }
 0x272   :  { %v306_v29 = vadd.f32 %v305_v28, %v208_v10  ;;  %v474_v31 = vpop.eup %473 }
 0x273   :  { %483 = vtanh.f32 %v304_v27 }
 0x274   :  { %485 = vtanh.f32 %v306_v29 }
 0x275   :  { %v476_v32 = vpop.eup %475 }
 0x276   :  { %v478_v33 = vpop.eup %477  ;;  %v432_v34 = vpack.c.bf16 %v476_v32, %v472_v30 }
 0x277   :  { %v430_v35 = vpack.c.bf16 %v478_v33, %v474_v31 }
 0x279   :  { %431 = vmatprep.subr.bf16.mxu0 %v430_v35  ;;  %v480_v36 = vpop.eup %479 }
 0x27a   :  { %433 = vmatpush1.bf16.msra.mxu0 %v432_v34  ;;  %v482_v37 = vpop.eup %481 }
 0x27d   :  { %v484_v38 = vpop.eup %483 }
 0x27e   :  { %v486_v39 = vpop.eup %485  ;;  %v436_v40 = vpack.c.bf16 %v484_v38, %v480_v36 }
 0x27f   :  { %v434_v41 = vpack.c.bf16 %v486_v39, %v482_v37 }
 0x281   :  { %435 = vmatprep.subr.bf16.mxu0 %v434_v41 }
 0x282   :  { %437 = vmatpush1.bf16.msra.mxu0 %v436_v40 }
 0x285   :  { %417 = vmatmul.mubr.msk.f32.vlgmr.msra.gmra.mrb[4].mxu0 %vm100_vm0, %v581_v12 }
 0x358   :  { %v390_v43 = vpop.f32.mrb[4].mxu0 }
 0x359   :  { %v391_v44 = vadd.f32 %v390_v43, %v320_v42  ;;  %v392_v45 = vpop.f32.mrb[5].mxu0 }
 0x35a   :  { %v393_v46 = vadd.f32 %v392_v45, %v320_v42 }
 0x35b   :  { %395 = vst [vmem:[#allocation2] sm:$0x1f] %v391_v44 }
 0x35c   :  { %396 = vst [vmem:[#allocation2 + $0x8] sm:$0x1f] %v393_v46 }
 0x35d   :  { %498 = shalt.err (!%p495_p4)
}
 0x35e   :  { %s499_s8 = scalar_lea.hbm %s618_s2, 256 }
 0x35f   :  { %p500_p5 = scmp.ne.s32.totalorder %s618_s2, %s499_s8  ;;  %p503_p6 = scmp.lt.u32.totalorder %s499_s8, %s618_s2 }
 0x361   :  { %p505_p7 = pnand %p503_p6, %p500_p5 }
 0x363   :  { %508 = shalt.err (!%p505_p7)
}
 0x364   :  { %406 = dma.vmem_to_hbm [thread:$0]  %s404_s1, 256, %s618_s2, [#allocation3]  }
 0x365   :  { %509 = dma.done.wait [#allocation3], 256  }
 0x366   :  { %510 = vsyncadd [#allocation3], 4294967040 }
 0x367   :  { %410 = vsyncpa [#allocation3], 1 }

</bundles_post_ra>
